<compile_context>
chip_gen: v7x
topology: tpu7x:2x2x1
jax: 0.10.0
libtpu: 0.0.40
codegen_flags: <defaults>
</compile_context>

<pallas_src>
import jax
import jax.numpy as jnp
from jax.experimental import pallas as pl
from jax.experimental.pallas import tpu as pltpu

NUM_CLASSES = 10
IN_FEATURES = 28 * 28

TM_MAX = 2048            # max batch tile for the grid path (VMEM-safe on all gens)
SINGLE_BLOCK_MAX = 256   # below this, a single no-grid call is cheapest
VMEM_LIMIT_BYTES = 48 << 20


def linear_kernel(x_ref, wt_ref, b_ref, o_ref):
    # x_ref: (tm, 784), wt_ref: (784, 10), b_ref: (1, 10), o_ref: (tm, 10)
    acc = jnp.dot(x_ref[...], wt_ref[...], preferred_element_type=jnp.float32)
    o_ref[...] = (acc + b_ref[...]).astype(o_ref.dtype)


def _cost_estimate(batch):
    return pl.CostEstimate(
        flops=2 * batch * IN_FEATURES * NUM_CLASSES,
        transcendentals=0,
        bytes_accessed=4 * (batch * IN_FEATURES
                            + IN_FEATURES * NUM_CLASSES
                            + batch * NUM_CLASSES),
    )


def _round_up(x, m):
    return ((x + m - 1) // m) * m


def baseline_model_forward(x, weight, bias):
    """x: (B, 1, 28, 28) float32 (NCHW). weight: (10, 784), bias: (10,)."""
    B = x.shape[0]
    x_flat = x.reshape(B, -1)                     # nn.Flatten()
    w_t = weight.T                                # (784, 10): one-time layout fix
    b2d = bias.reshape(1, NUM_CLASSES)            # 2D for VMEM tiling / broadcast

    if B <= SINGLE_BLOCK_MAX:
        # Small batch: one full-array block, no grid -> no pipeline overhead.
        return pl.pallas_call(
            linear_kernel,
            out_shape=jax.ShapeDtypeStruct((B, NUM_CLASSES), jnp.float32),
            cost_estimate=_cost_estimate(B),
        )(x_flat, w_t, b2d)

    # Tiled path: pick a tile that (a) never exceeds TM_MAX and (b) splits the
    # batch evenly over at least 2 tiles so both v7x TensorCores get equal rows.
    n_tiles_target = max(2, pl.cdiv(B, TM_MAX))
    tm = min(TM_MAX, _round_up(pl.cdiv(B, n_tiles_target), 8))
    n_tiles = pl.cdiv(B, tm)

    return pl.pallas_call(
        linear_kernel,
        out_shape=jax.ShapeDtypeStruct((B, NUM_CLASSES), jnp.float32),
        grid=(n_tiles,),
        in_specs=[
            pl.BlockSpec((tm, IN_FEATURES), lambda i: (i, 0),
                         pipeline_mode=pl.Buffered(3)),
            pl.BlockSpec((IN_FEATURES, NUM_CLASSES), lambda i: (0, 0)),
            pl.BlockSpec((1, NUM_CLASSES), lambda i: (0, 0)),
        ],
        out_specs=pl.BlockSpec((tm, NUM_CLASSES), lambda i: (i, 0)),
        compiler_params=pltpu.CompilerParams(
            dimension_semantics=("parallel",),
            vmem_limit_bytes=VMEM_LIMIT_BYTES,
        ),
        cost_estimate=_cost_estimate(B),
    )(x_flat, w_t, b2d)


if __name__ == "__main__":
    key = jax.random.PRNGKey(0)
    k_x, k_w, k_b, k_x2 = jax.random.split(key, 4)

    # nn.Linear(784, 10)-shaped parameters
    bound = 1.0 / (IN_FEATURES ** 0.5)
    weight = jax.random.uniform(
        k_w, (NUM_CLASSES, IN_FEATURES), jnp.float32, -bound, bound
    )
    bias = jax.random.uniform(
        k_b, (NUM_CLASSES,), jnp.float32, -bound, bound
    )

    # Small MNIST-like batch, NCHW -> small-batch (no-grid) path.
    x = jax.random.normal(k_x, (2, 1, 28, 28), jnp.float32)
    out = jax.block_until_ready(baseline_model_forward(x, weight, bias))
    ref = x.reshape(x.shape[0], -1) @ weight.T + bias
    assert out.shape == (2, NUM_CLASSES)
    assert jnp.allclose(out, ref, atol=1e-4, rtol=1e-4)

    # Ragged medium batch -> tiled, core-balanced, partial-boundary-block path.
    x_big = jax.random.normal(k_x2, (600, 1, 28, 28), jnp.float32)
    out_big = jax.block_until_ready(baseline_model_forward(x_big, weight, bias))
    ref_big = x_big.reshape(x_big.shape[0], -1) @ weight.T + bias
    assert out_big.shape == (600, NUM_CLASSES)
    assert jnp.allclose(out_big, ref_big, atol=1e-4, rtol=1e-4)

    print("KERNEL_OK")
</pallas_src>

<mosaic_0001>
module attributes {stable_mosaic.version = 11 : i64} {
  func.func @linear_kernel(%arg0: memref<2x784xf32, #tpu.memory_space<vmem>>, %arg1: memref<784x10xf32, #tpu.memory_space<vmem>>, %arg2: memref<1x10xf32, #tpu.memory_space<vmem>>, %arg3: memref<2x10xf32, #tpu.memory_space<vmem>>) attributes {dimension_semantics = [], scalar_prefetch = 0 : i64, scratch_operands = 0 : i64, tpu.core_type = #tpu.core_type<tc>} {
    %c0 = arith.constant 0 : index
    %c0_0 = arith.constant 0 : index
    %0 = vector.load %arg0[%c0, %c0_0] : memref<2x784xf32, #tpu.memory_space<vmem>>, vector<2x784xf32>
    %c0_1 = arith.constant 0 : index
    %c0_2 = arith.constant 0 : index
    %1 = vector.load %arg1[%c0_1, %c0_2] : memref<784x10xf32, #tpu.memory_space<vmem>>, vector<784x10xf32>
    %cst = arith.constant dense<0.000000e+00> : vector<2x10xf32>
    %2 = tpu.matmul %0, %1, %cst {dimension_numbers = #tpu.dot_dimension_numbers<[1], [0], [0], [1], [0, 0, 1, 1], [], []>} : vector<2x784xf32>, vector<784x10xf32>, vector<2x10xf32> -> vector<2x10xf32>
    %c0_3 = arith.constant 0 : index
    %c0_4 = arith.constant 0 : index
    %3 = vector.load %arg2[%c0_3, %c0_4] : memref<1x10xf32, #tpu.memory_space<vmem>>, vector<1x10xf32>
    %4 = vector.broadcast %3 : vector<1x10xf32> to vector<2x10xf32>
    %5 = arith.addf %2, %4 : vector<2x10xf32>
    %c0_5 = arith.constant 0 : index
    %c0_6 = arith.constant 0 : index
    %6 = vector.load %arg3[%c0_5, %c0_6] : memref<2x10xf32, #tpu.memory_space<vmem>>, vector<2x10xf32>
    tpu.vector_store %arg3[%c0_5, %c0_6], %5 {strides = array<i32>} : memref<2x10xf32, #tpu.memory_space<vmem>>, vector<2x10xf32>,
    return
  }
}

</mosaic_0001>

<bundles_post_ra>
// kernel: tpu_custom_call.1
= control target key start
LH: loop header
LB: loop body
LE: loop exit
PB: predicated region body
PF: predicated region fallthrough
CT: control target
= control target key end

     0   :  { %v709_v43 = vmov 1983009808   ;;  %v128_v45 = vlaneseq  ;;  %s1060_s0 = inlined_call_operand.vmem [shape: f32[2,784], index: 0, kind: input, shape index: {}]   ;;  %s1061_s1 = inlined_call_operand.vmem [shape: f32[784,10], index: 1, kind: input, shape index: {}]   ;;  %s1062_s2 = inlined_call_operand.vmem [shape: f32[1,10], index: 2, kind: input, shape index: {}]   ;;  %s1063_s3 = inlined_call_operand.hbm [shape: f32[2,10], index: 3, kind: output, shape index: {}]  }
   0x1   :  { %v33_v0 = vld [vmem:[%s1061_s1 + $0x80] sm:$0xff]  ;;  %v34_v1 = vld [vmem:[%s1061_s1 + $0x88] sm:$0xff]  ;;  %v35_v11 = vld [vmem:[%s1061_s1 + $0x90] sm:$0xff]  ;;  %v126_v44 = vunpack.c.l.s4 %v709_v43 }
   0x2   :  { %v17_v2 = vld [vmem:[%s1061_s1] sm:$0xff]  ;;  %v579_v3 = vpack.c.bf16 %v34_v1, %v33_v0  ;;  %v18_v4 = vld [vmem:[%s1061_s1 + $0x8] sm:$0xff]  ;;  %v36_v13 = vld [vmem:[%s1061_s1 + $0x98] sm:$0xff]  ;;  %v129_v60 = vshrl.u32 %v128_v45, 7 }
   0x3   :  { %v65_v5 = vld [vmem:[%s1061_s1 + $0x180] sm:$0xff]  ;;  %v66_v6 = vld [vmem:[%s1061_s1 + $0x188] sm:$0xff]  ;;  %v581_v7 = vpack.c.bf16 %v18_v4, %v17_v2  ;;  %v19_v14 = vld [vmem:[%s1061_s1 + $0x10] sm:$0xff]  ;;  %v583_v16 = vpack.c.bf16 %v36_v13, %v35_v11  ;;  %v127_v59 = vunpack.c.0.s8 %v126_v44 }
   0x4   :  { %v611_v8 = vpack.c.bf16 %v66_v6, %v65_v5  ;;  %v49_v9 = vld [vmem:[%s1061_s1 + $0x100] sm:$0xff]  ;;  %v50_v10 = vld [vmem:[%s1061_s1 + $0x108] sm:$0xff]  ;;  %580 = vmatprep.subr.bf16.mxu0 %v579_v3  ;;  %v20_v15 = vld [vmem:[%s1061_s1 + $0x18] sm:$0xff] }
   0x5   :  { %v613_v12 = vpack.c.bf16 %v50_v10, %v49_v9  ;;  %582 = vmatpush3.bf16.msra.mxu0 %v581_v7  ;;  %v585_v17 = vpack.c.bf16 %v20_v15, %v19_v14  ;;  %v67_v18 = vld [vmem:[%s1061_s1 + $0x190] sm:$0xff]  ;;  %v68_v19 = vld [vmem:[%s1061_s1 + $0x198] sm:$0xff]  ;;  %v37_v23 = vld [vmem:[%s1061_s1 + $0xa0] sm:$0xff]  ;;  %v878_v10 = vsub.s32 %v127_v59, %v129_v60 }
   0x6   :  { %612 = vmatprep.subr.bf16.mxu1 %v611_v8  ;;  %v51_v20 = vld [vmem:[%s1061_s1 + $0x110] sm:$0xff]  ;;  %v615_v21 = vpack.c.bf16 %v68_v19, %v67_v18  ;;  %v52_v22 = vld [vmem:[%s1061_s1 + $0x118] sm:$0xff]  ;;  %v38_v24 = vld [vmem:[%s1061_s1 + $0xa8] sm:$0xff]  ;;  %584 = vmatprep.subr.bf16.mxu0 %v583_v16 }
   0x7   :  { %614 = vmatpush3.bf16.msra.mxu1 %v613_v12  ;;  %v617_v25 = vpack.c.bf16 %v52_v22, %v51_v20  ;;  %v587_v26 = vpack.c.bf16 %v38_v24, %v37_v23  ;;  %v21_v27 = vld [vmem:[%s1061_s1 + $0x20] sm:$0xff]  ;;  %v22_v28 = vld [vmem:[%s1061_s1 + $0x28] sm:$0xff]  ;;  %v39_v35 = vld [vmem:[%s1061_s1 + $0xb0] sm:$0xff] }
   0x8   :  { %v69_v29 = vld [vmem:[%s1061_s1 + $0x1a0] sm:$0xff]  ;;  %616 = vmatprep.subr.bf16.mxu1 %v615_v21  ;;  %v70_v30 = vld [vmem:[%s1061_s1 + $0x1a8] sm:$0xff]  ;;  %v589_v33 = vpack.c.bf16 %v22_v28, %v21_v27  ;;  %v40_v36 = vld [vmem:[%s1061_s1 + $0xb8] sm:$0xff] }
   0x9   :  { %v53_v31 = vld [vmem:[%s1061_s1 + $0x120] sm:$0xff]  ;;  %v54_v32 = vld [vmem:[%s1061_s1 + $0x128] sm:$0xff]  ;;  %586 = vmatpush3.bf16.msra.mxu0 %v585_v17  ;;  %v619_v34 = vpack.c.bf16 %v70_v30, %v69_v29  ;;  %v23_v37 = vld [vmem:[%s1061_s1 + $0x30] sm:$0xff]  ;;  %v591_v39 = vpack.c.bf16 %v40_v36, %v39_v35 }
   0xa   :  { %588 = vmatprep.subr.bf16.mxu0 %v587_v26  ;;  %v621_v38 = vpack.c.bf16 %v54_v32, %v53_v31  ;;  %v24_v40 = vld [vmem:[%s1061_s1 + $0x38] sm:$0xff]  ;;  %v71_v41 = vld [vmem:[%s1061_s1 + $0x1b0] sm:$0xff]  ;;  %v41_v49 = vld [vmem:[%s1061_s1 + $0xc0] sm:$0xff] }
   0xb   :  { %618 = vmatpush3.bf16.msra.mxu1 %v617_v25  ;;  %v72_v42 = vld [vmem:[%s1061_s1 + $0x1b8] sm:$0xff]  ;;  %v55_v47 = vld [vmem:[%s1061_s1 + $0x130] sm:$0xff]  ;;  %v42_v50 = vld [vmem:[%s1061_s1 + $0xc8] sm:$0xff]  ;;  %v593_v51 = vpack.c.bf16 %v24_v40, %v23_v37 }
   0xc   :  { %620 = vmatprep.subr.bf16.mxu1 %v619_v34  ;;  %v623_v46 = vpack.c.bf16 %v72_v42, %v71_v41  ;;  %v56_v48 = vld [vmem:[%s1061_s1 + $0x138] sm:$0xff]  ;;  %v73_v52 = vld [vmem:[%s1061_s1 + $0x1c0] sm:$0xff]  ;;  %v74_v53 = vld [vmem:[%s1061_s1 + $0x1c8] sm:$0xff]  ;;  %v595_v55 = vpack.c.bf16 %v42_v50, %v41_v49 }
   0xd   :  { %590 = vmatpush3.bf16.msra.mxu0 %v589_v33  ;;  %v625_v54 = vpack.c.bf16 %v56_v48, %v55_v47  ;;  %v25_v56 = vld [vmem:[%s1061_s1 + $0x40] sm:$0xff]  ;;  %v26_v57 = vld [vmem:[%s1061_s1 + $0x48] sm:$0xff]  ;;  %v627_v61 = vpack.c.bf16 %v74_v53, %v73_v52  ;;  %v43_v63 = vld [vmem:[%s1061_s1 + $0xd0] sm:$0xff] }
   0xe   :  { %592 = vmatprep.subr.bf16.mxu0 %v591_v39  ;;  %v57_v58 = vld [vmem:[%s1061_s1 + $0x140] sm:$0xff]  ;;  %v58_v62 = vld [vmem:[%s1061_s1 + $0x148] sm:$0xff]  ;;  %v44_v0 = vld [vmem:[%s1061_s1 + $0xd8] sm:$0xff]  ;;  %v597_v3 = vpack.c.bf16 %v26_v57, %v25_v56 }
   0xf   :  { %622 = vmatpush3.bf16.msra.mxu1 %v621_v38  ;;  %v75_v1 = vld [vmem:[%s1061_s1 + $0x1d0] sm:$0xff]  ;;  %v76_v2 = vld [vmem:[%s1061_s1 + $0x1d8] sm:$0xff]  ;;  %v629_v5 = vpack.c.bf16 %v58_v62, %v57_v58  ;;  %v599_v6 = vpack.c.bf16 %v44_v0, %v43_v63  ;;  %v45_v12 = vld [vmem:[%s1061_s1 + $0xe0] sm:$0xff] }
  0x10   :  { %624 = vmatprep.subr.bf16.mxu1 %v623_v46  ;;  %v27_v4 = vld [vmem:[%s1061_s1 + $0x50] sm:$0xff]  ;;  %v28_v7 = vld [vmem:[%s1061_s1 + $0x58] sm:$0xff]  ;;  %v631_v11 = vpack.c.bf16 %v76_v2, %v75_v1  ;;  %v46_v13 = vld [vmem:[%s1061_s1 + $0xe8] sm:$0xff] }
  0x11   :  { %594 = vmatpush3.bf16.msra.mxu0 %v593_v51  ;;  %v59_v8 = vld [vmem:[%s1061_s1 + $0x150] sm:$0xff]  ;;  %v60_v9 = vld [vmem:[%s1061_s1 + $0x158] sm:$0xff]  ;;  %v77_v14 = vld [vmem:[%s1061_s1 + $0x1e0] sm:$0xff]  ;;  %v601_v16 = vpack.c.bf16 %v28_v7, %v27_v4  ;;  %v603_v19 = vpack.c.bf16 %v46_v13, %v45_v12 }
  0x12   :  { %596 = vmatprep.subr.bf16.mxu0 %v595_v55  ;;  %v78_v15 = vld [vmem:[%s1061_s1 + $0x1e8] sm:$0xff]  ;;  %v633_v17 = vpack.c.bf16 %v60_v9, %v59_v8  ;;  %v15_v18 = vld [vmem:[%s1060_s0] sm:$0xff]  ;;  %v47_v27 = vld [vmem:[%s1061_s1 + $0xf0] sm:$0xff] }
  0x13   :  { %626 = vmatpush3.bf16.msra.mxu1 %v625_v54  ;;  %v29_v20 = vld [vmem:[%s1061_s1 + $0x60] sm:$0xff]  ;;  %v30_v21 = vld [vmem:[%s1061_s1 + $0x68] sm:$0xff]  ;;  %v131_v23 = vrot.slane %v15_v18, %v878_v10  ;;  %v124_v24 = vcombine.high %v15_v18, %v15_v18  ;;  %v635_v25 = vpack.c.bf16 %v78_v15, %v77_v14  ;;  %v48_v28 = vld [vmem:[%s1061_s1 + $0xf8] sm:$0xff] }
  0x14   :  { %628 = vmatprep.subr.bf16.mxu1 %v627_v61  ;;  %v61_v22 = vld [vmem:[%s1061_s1 + $0x160] sm:$0xff]  ;;  %v62_v26 = vld [vmem:[%s1061_s1 + $0x168] sm:$0xff]  ;;  %v79_v29 = vld [vmem:[%s1061_s1 + $0x1f0] sm:$0xff]  ;;  %v605_v33 = vpack.c.bf16 %v30_v21, %v29_v20  ;;  %v607_v35 = vpack.c.bf16 %v48_v28, %v47_v27 }
  0x15   :  { %598 = vmatpush3.bf16.msra.mxu0 %v597_v3  ;;  %v80_v30 = vld [vmem:[%s1061_s1 + $0x1f8] sm:$0xff]  ;;  %v139_v31 = vcombine.high %v131_v23, %v131_v23  ;;  %v138_v32 = vrot.slane %v124_v24, %v878_v10  ;;  %v637_v34 = vpack.c.bf16 %v62_v26, %v61_v22  ;;  %v31_v36 = vld [vmem:[%s1061_s1 + $0x70] sm:$0xff]  ;;  %v97_v42 = vld [vmem:[%s1061_s1 + $0x280] sm:$0xff] }
  0x16   :  { %600 = vmatprep.subr.bf16.mxu0 %v599_v6  ;;  %v32_v37 = vld [vmem:[%s1061_s1 + $0x78] sm:$0xff]  ;;  %v63_v38 = vld [vmem:[%s1061_s1 + $0x170] sm:$0xff]  ;;  %v639_v40 = vpack.c.bf16 %v80_v30, %v79_v29  ;;  %v98_v43 = vld [vmem:[%s1061_s1 + $0x288] sm:$0xff] }
  0x17   :  { %630 = vmatpush3.bf16.msra.mxu1 %v629_v5  ;;  %v140_v39 = vcombine.high %v138_v32, %v138_v32  ;;  %230 = vmatprep.mubr.f32.mxu0 %v139_v31  ;;  %v64_v41 = vld [vmem:[%s1061_s1 + $0x178] sm:$0xff]  ;;  %v609_v44 = vpack.c.bf16 %v32_v37, %v31_v36  ;;  %v643_v46 = vpack.c.bf16 %v98_v43, %v97_v42  ;;  %v81_v47 = vld [vmem:[%s1061_s1 + $0x200] sm:$0xff]  ;;  %v82_v48 = vld [vmem:[%s1061_s1 + $0x208] sm:$0xff] }
  0x18   :  { %632 = vmatprep.subr.bf16.mxu1 %v631_v11  ;;  %v641_v45 = vpack.c.bf16 %v64_v41, %v63_v38  ;;  %v99_v49 = vld [vmem:[%s1061_s1 + $0x290] sm:$0xff]  ;;  %v100_v50 = vld [vmem:[%s1061_s1 + $0x298] sm:$0xff]  ;;  %v645_v51 = vpack.c.bf16 %v82_v48, %v81_v47  ;;  %v16_v53 = vld [vmem:[%s1060_s0 + $0x8] sm:$0x3f] }
  0x19   :  { %602 = vmatpush3.bf16.msra.mxu0 %v601_v16  ;;  %300 = vmatprep.mubr.f32.mxu1 %v140_v39  ;;  %v83_v52 = vld [vmem:[%s1061_s1 + $0x210] sm:$0xff]  ;;  %v113_v54 = vld [vmem:[%s1061_s1 + $0x300] sm:$0xff]  ;;  %v647_v55 = vpack.c.bf16 %v100_v50, %v99_v49  ;;  %v84_v56 = vld [vmem:[%s1061_s1 + $0x218] sm:$0xff]  ;;  %v141_v57 = vcombine.high %v16_v53, %v16_v53  ;;  %v964_v58 = vrot.slane %v16_v53, %v878_v10 }
  0x1a   :  { %604 = vmatprep.subr.bf16.mxu0 %v603_v19  ;;  %v114_v59 = vld [vmem:[%s1061_s1 + $0x308] sm:$0xff] }
  0x1b   :  { %634 = vmatpush3.bf16.msra.mxu1 %v633_v17 }
  0x1c   :  { %636 = vmatprep.subr.bf16.mxu1 %v635_v25 }
  0x1d   :  { %606 = vmatpush3.bf16.msra.mxu0 %v605_v33 }
  0x1e   :  { %608 = vmatprep.subr.bf16.mxu0 %v607_v35 }
  0x1f   :  { %638 = vmatpush3.bf16.msra.mxu1 %v637_v34 }
  0x20   :  { %640 = vmatprep.subr.bf16.mxu1 %v639_v40 }
  0x21   :  { %610 = vmatpush3.bf16.msra.mxu0 %v609_v44 }
  0x22   :  { %644 = vmatprep.subr.bf16.mxu0 %v643_v46 }
  0x23   :  { %642 = vmatpush3.bf16.msra.mxu1 %v641_v45 }
  0x24   :  { %8 = vsyncpa [#allocation3], 0  ;;  %v101_v60 = vld [vmem:[%s1061_s1 + $0x2a0] sm:$0xff]  ;;  %v102_v61 = vld [vmem:[%s1061_s1 + $0x2a8] sm:$0xff]  ;;  %v710_v62 = vmov 0.0|0.0   ;;  %v676_v63 = vpack.c.bf16 %v114_v59, %v113_v54  ;;  %231 = vmatmul.mubr.f32.vlgmr.msra.gmra.mrb[0].mxu0 %v131_v23  ;;  %v156_v0 = vcombine.high %v964_v58, %v964_v58  ;;  %v649_v1 = vpack.c.bf16 %v84_v56, %v83_v52 }
  0x25   :  { %675 = vmatprep.subr.bf16.mxu1 %v710_v62  ;;  %646 = vmatpush3.bf16.msra.mxu0 %v645_v51  ;;  %v651_v2 = vpack.c.bf16 %v102_v61, %v101_v60  ;;  %v85_v3 = vld [vmem:[%s1061_s1 + $0x220] sm:$0xff]  ;;  %v86_v4 = vld [vmem:[%s1061_s1 + $0x228] sm:$0xff]  ;;  %v155_v5 = vrot.slane %v141_v57, %v878_v10  ;;  %v103_v6 = vld [vmem:[%s1061_s1 + $0x2b0] sm:$0xff]  ;;  %vm711_vm0 = vmmov 0   ;;  %v712_v8 = vmov 0.0  }
  0x26   :  { %301 = vmatmul.mubr.f32.vlgmr.msra.gmra.mrb[0].mxu1 %v138_v32  ;;  %648 = vmatprep.subr.bf16.mxu0 %v647_v55  ;;  %v104_v7 = vld [vmem:[%s1061_s1 + $0x2b8] sm:$0xff]  ;;  %vm163_vm1 = vcmask 130048   ;;  %v653_v9 = vpack.c.bf16 %v86_v4, %v85_v3  ;;  %v87_v10 = vld [vmem:[%s1061_s1 + $0x230] sm:$0xff]  ;;  %v105_v13 = vld [vmem:[%s1061_s1 + $0x2c0] sm:$0xff]  ;;  %vm446_vm2 = vcmask 74752  }
  0x27   :  { %370 = vmatprep.mubr.f32.mxu0 %v156_v0  ;;  %677 = vmatpush3.bf16.msra.mxu1 %v676_v63  ;;  %v655_v11 = vpack.c.bf16 %v104_v7, %v103_v6  ;;  %v88_v12 = vld [vmem:[%s1061_s1 + $0x238] sm:$0xff]  ;;  %v106_v14 = vld [vmem:[%s1061_s1 + $0x2c8] sm:$0xff]  ;;  %v89_v17 = vld [vmem:[%s1061_s1 + $0x240] sm:$0xff] }
  0x28   :  { %576 = vmatprep.mubr.msk.f32.mxu1 %vm711_vm0, %v712_v8  ;;  %v657_v15 = vpack.c.bf16 %v88_v12, %v87_v10  ;;  %v659_v16 = vpack.c.bf16 %v106_v14, %v105_v13  ;;  %v90_v18 = vld [vmem:[%s1061_s1 + $0x248] sm:$0xff]  ;;  %v107_v19 = vld [vmem:[%s1061_s1 + $0x2d0] sm:$0xff]  ;;  %v108_v20 = vld [vmem:[%s1061_s1 + $0x2d8] sm:$0xff] }
  0x29   :  { %650 = vmatpush3.bf16.msra.mxu0 %v649_v1  ;;  %v661_v21 = vpack.c.bf16 %v90_v18, %v89_v17  ;;  %v663_v22 = vpack.c.bf16 %v108_v20, %v107_v19  ;;  %v91_v23 = vld [vmem:[%s1061_s1 + $0x250] sm:$0xff]  ;;  %v92_v24 = vld [vmem:[%s1061_s1 + $0x258] sm:$0xff]  ;;  %v109_v25 = vld [vmem:[%s1061_s1 + $0x2e0] sm:$0xff] }
  0x2a   :  { %652 = vmatprep.subr.bf16.mxu0 %v651_v2  ;;  %577 = vmatmul.mubr.msk.f32.vlgmr.msra.gmra.mrb[2].mxu1 %vm163_vm1, %v155_v5  ;;  %v110_v26 = vld [vmem:[%s1061_s1 + $0x2e8] sm:$0xff]  ;;  %v665_v27 = vpack.c.bf16 %v92_v24, %v91_v23  ;;  %v93_v29 = vld [vmem:[%s1061_s1 + $0x260] sm:$0xff]  ;;  %v111_v31 = vld [vmem:[%s1061_s1 + $0x2f0] sm:$0xff] }
  0x2b   :  { %v667_v28 = vpack.c.bf16 %v110_v26, %v109_v25  ;;  %v94_v30 = vld [vmem:[%s1061_s1 + $0x268] sm:$0xff]  ;;  %v112_v32 = vld [vmem:[%s1061_s1 + $0x2f8] sm:$0xff]  ;;  %v95_v35 = vld [vmem:[%s1061_s1 + $0x270] sm:$0xff] }
  0x2c   :  { %v669_v33 = vpack.c.bf16 %v94_v30, %v93_v29  ;;  %v671_v34 = vpack.c.bf16 %v112_v32, %v111_v31  ;;  %v96_v36 = vld [vmem:[%s1061_s1 + $0x278] sm:$0xff]  ;;  %v462_v39 = vld [vmem:[%s1062_s2] ss:$0 sm:$0xff]  ;;  %s713_s1 = smov [#allocation2]  }
  0x2d   :  { %654 = vmatpush3.bf16.msra.mxu0 %v653_v9  ;;  %v673_v37 = vpack.c.bf16 %v96_v36, %v95_v35  ;;  %s454_s23 = sshll.u32 %s713_s1, 4  ;;  %s455_s23 = int_to_ptr.vmem [resolvable:$true] %s454_s23 }
  0x2e   :  { %656 = vmatprep.subr.bf16.mxu0 %v655_v11  ;;  %s685_s2 = scalar_lea.vmem %s455_s23, 32  ;;  %p690_p1 = scmp.lt.s32.totalorder %s455_s23, %s455_s23 }
  0x2f   :  { %p686_p0 = scmp.ne.s32.totalorder %s455_s23, %s685_s2  ;;  %p691_p2 = scmp.lt.s32.totalorder %s685_s2, %s685_s2 }
  0x31   :  { %658 = vmatpush3.bf16.msra.mxu0 %v657_v15  ;;  %p692_p3 = por %p691_p2, %p690_p1 }
  0x32   :  { %660 = vmatprep.subr.bf16.mxu0 %v659_v16 }
  0x33   :  { %p693_p4 = pnand %p692_p3, %p686_p0 }
  0x35   :  { %662 = vmatpush3.bf16.msra.mxu0 %v661_v21 }
  0x36   :  { %664 = vmatprep.subr.bf16.mxu0 %v663_v22 }
  0x39   :  { %666 = vmatpush3.bf16.msra.mxu0 %v665_v27 }
  0x3a   :  { %668 = vmatprep.subr.bf16.mxu0 %v667_v28 }
  0x3d   :  { %670 = vmatpush3.bf16.msra.mxu0 %v669_v33 }
  0x3e   :  { %672 = vmatprep.subr.bf16.mxu0 %v671_v34 }
  0x41   :  { %674 = vmatpush3.bf16.msra.mxu0 %v673_v37 }
  0x44   :  { %371 = vmatmul.mubr.f32.vlgmr.msra.gmra.mrb[2].mxu0 %v964_v58 }
  0xf7   :  { %v496_v38 = vpop.f32.mrb[0].mxu0 }
  0xf8   :  { %v497_v40 = vpop.f32.mrb[1].mxu0 }
  0xf9   :  { %v531_v41 = vpop.f32.mrb[0].mxu1  ;;  %v498_v42 = vadd.f32 %v497_v40, %v496_v38 }
  0xfa   :  { %v532_v43 = vpop.f32.mrb[1].mxu1 }
  0xfb   :  { %v533_v44 = vadd.f32 %v532_v43, %v531_v41  ;;  %v233_v45 = vadd.f32 %v498_v42, %v462_v39 }
  0xfd   :  { %v303_v46 = vadd.f32 %v533_v44, %v233_v45  ;;  %v442_v47 = vpop.f32.mrb[2].mxu1 }
  0xfe   :  { %v578_v48 = vpop.f32.mrb[3].mxu1 }
 0x117   :  { %v566_v49 = vpop.f32.mrb[2].mxu0 }
 0x118   :  { %v567_v50 = vpop.f32.mrb[3].mxu0 }
 0x119   :  { %v568_v51 = vadd.f32 %v567_v50, %v566_v49 }
 0x11b   :  { %v373_v52 = vadd.f32 %v568_v51, %v303_v46 }
 0x11d   :  { %v443_v53 = vadd.f32 %v442_v47, %v373_v52 }
 0x11f   :  { %447 = vst.msk [vmem:[#allocation2] sm:$0x3] %vm446_vm2, %v443_v53 }
 0x120   :  { %696 = shalt.err (!%p693_p4)
}
 0x121   :  { %s697_s26 = scalar_lea.hbm %s1063_s3, 32 }
 0x122   :  { %p698_p5 = scmp.ne.s32.totalorder %s1063_s3, %s697_s26  ;;  %p701_p6 = scmp.lt.u32.totalorder %s697_s26, %s1063_s3 }
 0x124   :  { %p703_p7 = pnand %p701_p6, %p698_p5 }
 0x126   :  { %706 = shalt.err (!%p703_p7)
}
 0x127   :  { %457 = dma.vmem_to_hbm [thread:$0]  %s455_s23, 32, %s1063_s3, [#allocation3]  }
 0x128   :  { %707 = dma.done.wait [#allocation3], 32  }
 0x129   :  { %708 = vsyncadd [#allocation3], 4294967264 }
 0x12a   :  { %461 = vsyncpa [#allocation3], 1 }

</bundles_post_ra>
